<compile_context>
chip_gen: v5e
topology: v5e:2x2
jax: 0.10.0
libtpu: 0.0.40
codegen_flags: <defaults>
</compile_context>

<pallas_src>
import functools
import math

import jax
import jax.numpy as jnp
from jax.experimental import pallas as pl
from jax.experimental.pallas import tpu as pltpu


def _epe_kernel(pred_ref, label_ref, out_ref, acc_ref, *, eps, inv_hw,
                pad_correction):
    # pred_ref / label_ref: (1, C, T) tile
    # acc_ref:              (1, T) lane-wise partial-sum scratch (persists over t)
    # out_ref:              (1, 1, 128) per-batch result block (resident over t)
    t = pl.program_id(1)

    @pl.when(t == 0)
    def _():
        acc_ref[...] = jnp.zeros_like(acc_ref)

    p = pred_ref[0].astype(jnp.float32)                 # (C, T)
    l = label_ref[0].astype(jnp.float32)                # (C, T)
    d = p - l
    sq_sum = jnp.sum(d * d, axis=0, keepdims=True)      # (1, T) channel reduce
    # Lane-wise accumulation only; cross-lane reduce deferred to the last tile.
    acc_ref[...] += jnp.sqrt(sq_sum + jnp.float32(eps))

    @pl.when(t == pl.num_programs(1) - 1)
    def _():
        total = jnp.sum(acc_ref[...])                   # one XLU reduce / batch
        val = (total - jnp.float32(pad_correction)) * jnp.float32(inv_hw)
        out_ref[...] = jnp.zeros_like(out_ref) + val


def _choose_tile_hw(hw, c, max_tile_cap=8192):
    """Largest lane-aligned spatial tile that keeps 2 double-buffered inputs
    (with C padded to a multiple of 8 sublanes, budgeted as f32) under ~8 MiB."""
    padded_c = -(-c // 8) * 8
    max_tile = (8 * 1024 * 1024) // (2 * 2 * padded_c * 4)
    max_tile = max(128, min(max_tile_cap, (max_tile // 128) * 128))
    hw128 = -(-hw // 128) * 128
    if hw128 <= max_tile:
        return hw128
    # Prefer a tile that divides the 128-rounded extent (minimal padding).
    t = max_tile
    while t >= 2048:
        if hw128 % t == 0:
            return t
        t -= 128
    return max_tile


def epe_loss(pred, label, eps=0.0):
    """Pallas EPE loss. pred/label: (B, C, H, W) -> (B,) float32."""
    B, C, H, W = pred.shape
    assert label.shape == pred.shape
    HW = H * W

    tile_hw = _choose_tile_hw(HW, C)
    hw_pad = -(-HW // tile_hw) * tile_hw
    n_tiles = hw_pad // tile_hw
    n_pad = hw_pad - HW

    p = pred.reshape(B, C, HW)
    l = label.reshape(B, C, HW)
    if n_pad:
        # Zero padding: each padded pixel contributes exactly sqrt(eps),
        # subtracted analytically in the kernel finalize.
        p = jnp.pad(p, ((0, 0), (0, 0), (0, n_pad)))
        l = jnp.pad(l, ((0, 0), (0, 0), (0, n_pad)))

    pad_correction = float(n_pad) * math.sqrt(float(eps))

    kernel = functools.partial(
        _epe_kernel, eps=float(eps), inv_hw=1.0 / float(HW),
        pad_correction=pad_correction)

    # Explicit VMEM budget: 2 inputs x 2 pipeline buffers x padded-C x tile,
    # budgeted as f32 (upper bound), + lane accumulator + output block.
    padded_c = -(-C // 8) * 8
    in_bytes = 2 * 2 * padded_c * tile_hw * 4
    scratch_bytes = 8 * tile_hw * 4
    out_bytes = 2 * 8 * 128 * 4
    vmem_limit = int(min(48 * 2**20,
                         max(2 * (in_bytes + scratch_bytes + out_bytes),
                             16 * 2**20)))

    # TODO(synk): for B == 1 on v7x, a size-2 parallel spatial split would let
    # the second TensorCore share the reduction; not needed for B >= 2.
    out = pl.pallas_call(
        kernel,
        out_shape=jax.ShapeDtypeStruct((B, 1, 128), jnp.float32),
        grid_spec=pltpu.PrefetchScalarGridSpec(
            num_scalar_prefetch=0,
            grid=(B, n_tiles),
            in_specs=[
                pl.BlockSpec((1, C, tile_hw), lambda b, t: (b, 0, t)),
                pl.BlockSpec((1, C, tile_hw), lambda b, t: (b, 0, t)),
            ],
            out_specs=pl.BlockSpec((1, 1, 128), lambda b, t: (b, 0, 0)),
            scratch_shapes=[pltpu.VMEM((1, tile_hw), jnp.float32)],
        ),
        compiler_params=pltpu.CompilerParams(
            dimension_semantics=("parallel", "arbitrary"),
            vmem_limit_bytes=vmem_limit,
        ),
    )(p, l)

    return out[:, 0, 0]  # (B,)


def epe_loss_ref(pred, label, eps=0.0):
    d = pred.astype(jnp.float32) - label.astype(jnp.float32)
    loss = jnp.sqrt(jnp.sum(d * d, axis=1) + eps)          # (B, H, W)
    return jnp.mean(loss.reshape(loss.shape[0], -1), axis=1)


if __name__ == "__main__":
    key = jax.random.PRNGKey(0)
    k1, k2, k3, k4 = jax.random.split(key, 4)

    # Case 1: flow-style EPE (2 channels), lane-aligned spatial extent, eps=0.
    B, C, H, W = 2, 2, 16, 16
    pred = jax.random.normal(k1, (B, C, H, W), dtype=jnp.float32)
    label = jax.random.normal(k2, (B, C, H, W), dtype=jnp.float32)
    out = jax.block_until_ready(epe_loss(pred, label, eps=0.0))
    ref = jax.block_until_ready(epe_loss_ref(pred, label, eps=0.0))
    assert out.shape == (B,)
    assert jnp.allclose(out, ref, atol=1e-5, rtol=1e-5), (out, ref)

    # Case 2: non-128-multiple spatial extent (padded-HW path) and eps > 0.
    B2, C2, H2, W2 = 3, 4, 15, 13
    pred2 = jax.random.normal(k3, (B2, C2, H2, W2), dtype=jnp.float32)
    label2 = jax.random.normal(k4, (B2, C2, H2, W2), dtype=jnp.float32)
    out2 = jax.block_until_ready(epe_loss(pred2, label2, eps=1e-6))
    ref2 = jax.block_until_ready(epe_loss_ref(pred2, label2, eps=1e-6))
    assert jnp.allclose(out2, ref2, atol=1e-4, rtol=1e-4), (out2, ref2)

    # Case 3: bf16 inputs (half the HBM traffic; kernel accumulates in f32).
    pred3 = pred.astype(jnp.bfloat16)
    label3 = label.astype(jnp.bfloat16)
    out3 = jax.block_until_ready(epe_loss(pred3, label3, eps=0.0))
    ref3 = jax.block_until_ready(epe_loss_ref(pred3, label3, eps=0.0))
    assert jnp.allclose(out3, ref3, atol=2e-2, rtol=2e-2), (out3, ref3)

    print("KERNEL_OK")
</pallas_src>

<mosaic_0001>
module attributes {stable_mosaic.version = 11 : i64} {
  func.func @_epe_kernel(%arg0: i32, %arg1: i32, %arg2: memref<1x2x256xf32, #tpu.memory_space<vmem>>, %arg3: memref<1x2x256xf32, #tpu.memory_space<vmem>>, %arg4: memref<1x1x128xf32, #tpu.memory_space<vmem>>, %arg5: memref<1x256xf32, #tpu.memory_space<vmem>>) attributes {dimension_semantics = [#tpu.dimension_semantics<parallel>, #tpu.dimension_semantics<arbitrary>], iteration_bounds = array<i64: 2, 1>, scalar_prefetch = 0 : i64, scratch_operands = 1 : i64, tpu.core_type = #tpu.core_type<tc>, window_params = [{transform_indices = @transform_0, window_bounds = array<i64: 1, 2, 256>}, {transform_indices = @transform_1, window_bounds = array<i64: 1, 2, 256>}, {transform_indices = @transform_2, window_bounds = array<i64: 1, 1, 128>}]} {
    %c0_i32 = arith.constant 0 : i32
    %0 = arith.cmpi eq, %arg1, %c0_i32 : i32
    %1 = arith.extui %0 : i1 to i32
    %c0_i32_0 = arith.constant 0 : i32
    %2 = arith.cmpi ne, %1, %c0_i32_0 : i32
    scf.if %2 {
      %cst_13 = arith.constant 0.000000e+00 : f32
      %20 = vector.broadcast %cst_13 : f32 to vector<1x256xf32>
      %c0_14 = arith.constant 0 : index
      %c0_15 = arith.constant 0 : index
      %21 = vector.load %arg5[%c0_14, %c0_15] : memref<1x256xf32, #tpu.memory_space<vmem>>, vector<1x256xf32>
      tpu.vector_store %arg5[%c0_14, %c0_15], %20 {strides = array<i32>} : memref<1x256xf32, #tpu.memory_space<vmem>>, vector<1x256xf32>,
    } else {
    }
    %c0 = arith.constant 0 : index
    %c0_1 = arith.constant 0 : index
    %c0_2 = arith.constant 0 : index
    %3 = vector.load %arg2[%c0, %c0_1, %c0_2] : memref<1x2x256xf32, #tpu.memory_space<vmem>>, vector<1x2x256xf32>
    %4 = vector.shape_cast %3 : vector<1x2x256xf32> to vector<2x256xf32>
    %c0_3 = arith.constant 0 : index
    %c0_4 = arith.constant 0 : index
    %c0_5 = arith.constant 0 : index
    %5 = vector.load %arg3[%c0_3, %c0_4, %c0_5] : memref<1x2x256xf32, #tpu.memory_space<vmem>>, vector<1x2x256xf32>
    %6 = vector.shape_cast %5 : vector<1x2x256xf32> to vector<2x256xf32>
    %7 = arith.subf %4, %6 : vector<2x256xf32>
    %8 = arith.mulf %7, %7 : vector<2x256xf32>
    %cst = arith.constant dense<0.000000e+00> : vector<256xf32>
    %9 = vector.multi_reduction <add>, %8, %cst [0] : vector<2x256xf32> to vector<256xf32>
    %10 = vector.shape_cast %9 : vector<256xf32> to vector<1x256xf32>
    %c0_6 = arith.constant 0 : index
    %c0_7 = arith.constant 0 : index
    %11 = vector.load %arg5[%c0_6, %c0_7] : memref<1x256xf32, #tpu.memory_space<vmem>>, vector<1x256xf32>
    %cst_8 = arith.constant 0.000000e+00 : f32
    %12 = vector.broadcast %cst_8 : f32 to vector<1x256xf32>
    %13 = arith.addf %10, %12 : vector<1x256xf32>
    %14 = math.sqrt %13 : vector<1x256xf32>
    %15 = arith.addf %11, %14 : vector<1x256xf32>
    %c0_9 = arith.constant 0 : index
    %c0_10 = arith.constant 0 : index
    %16 = vector.load %arg5[%c0_9, %c0_10] : memref<1x256xf32, #tpu.memory_space<vmem>>, vector<1x256xf32>
    tpu.vector_store %arg5[%c0_9, %c0_10], %15 {strides = array<i32>} : memref<1x256xf32, #tpu.memory_space<vmem>>, vector<1x256xf32>,
    %c0_i32_11 = arith.constant 0 : i32
    %17 = arith.cmpi eq, %arg1, %c0_i32_11 : i32
    %18 = arith.extui %17 : i1 to i32
    %c0_i32_12 = arith.constant 0 : i32
    %19 = arith.cmpi ne, %18, %c0_i32_12 : i32
    scf.if %19 {
      %c0_13 = arith.constant 0 : index
      %c0_14 = arith.constant 0 : index
      %20 = vector.load %arg5[%c0_13, %c0_14] : memref<1x256xf32, #tpu.memory_space<vmem>>, vector<1x256xf32>
      %21 = vector.shape_cast %20 : vector<1x256xf32> to vector<1x1x256xf32>
      %cst_15 = arith.constant dense<0.000000e+00> : vector<1xf32>
      %22 = vector.multi_reduction <add>, %21, %cst_15 [1, 2] : vector<1x1x256xf32> to vector<1xf32>
      %23 = vector.shape_cast %22 : vector<1xf32> to vector<1x1x1xf32>
      %24 = vector.extract %23[0, 0, 0] : f32 from vector<1x1x1xf32>
      %cst_16 = arith.constant 0.000000e+00 : f32
      %25 = arith.subf %24, %cst_16 : f32
      %cst_17 = arith.constant 3.906250e-03 : f32
      %26 = arith.mulf %25, %cst_17 : f32
      %cst_18 = arith.constant 0.000000e+00 : f32
      %27 = vector.broadcast %cst_18 : f32 to vector<1x1x128xf32>
      %28 = vector.broadcast %26 : f32 to vector<1x1x128xf32>
      %29 = arith.addf %27, %28 : vector<1x1x128xf32>
      %c0_19 = arith.constant 0 : index
      %c0_20 = arith.constant 0 : index
      %c0_21 = arith.constant 0 : index
      %30 = vector.load %arg4[%c0_19, %c0_20, %c0_21] : memref<1x1x128xf32, #tpu.memory_space<vmem>>, vector<1x1x128xf32>
      tpu.vector_store %arg4[%c0_19, %c0_20, %c0_21], %29 {strides = array<i32>} : memref<1x1x128xf32, #tpu.memory_space<vmem>>, vector<1x1x128xf32>,
    } else {
    }
    return
  }
  func.func @transform_0(%arg0: i32, %arg1: i32) -> (i32, i32, i32) {
    %c0_i32 = arith.constant 0 : i32
    %c0_i32_0 = arith.constant 0 : i32
    return %arg0, %c0_i32, %arg1 : i32, i32, i32
  }
  func.func @transform_1(%arg0: i32, %arg1: i32) -> (i32, i32, i32) {
    %c0_i32 = arith.constant 0 : i32
    %c0_i32_0 = arith.constant 0 : i32
    return %arg0, %c0_i32, %arg1 : i32, i32, i32
  }
  func.func @transform_2(%arg0: i32, %arg1: i32) -> (i32, i32, i32) {
    %c0_i32 = arith.constant 0 : i32
    %c0_i32_0 = arith.constant 0 : i32
    %c0_i32_1 = arith.constant 0 : i32
    return %arg0, %c0_i32, %c0_i32_0 : i32, i32, i32
  }
}

</mosaic_0001>

<bundles_post_ra>
// kernel: tpu_custom_call.1
= control target key start
LH: loop header
LB: loop body
LE: loop exit
PB: predicated region body
PF: predicated region fallthrough
CT: control target
= control target key end

     0   :  { %7 = vsyncpa [#allocation4], 0  ;;  %s829_s0 = inlined_call_operand.hbm [shape: f32[2,2,256], index: 0, kind: input, shape index: {}]   ;;  %s830_s1 = inlined_call_operand.hbm [shape: f32[2,2,256], index: 1, kind: input, shape index: {}]   ;;  %s831_s2 = inlined_call_operand.hbm [shape: f32[2,1,128], index: 2, kind: output, shape index: {}]  }
   0x1   :  { %9 = vsyncpa [#allocation4 + $0x1], 0 }
   0x2   :  { %10 = vsyncpa [#allocation7], 0 }
   0x3   :  { %12 = vsyncpa [#allocation7 + $0x1], 0 }
   0x4   :  { %13 = vsyncpa [#allocation5], 0 }
   0x5   :  { %15 = vsyncpa [#allocation5 + $0x1], 0  ;;  %s692_s9 = smov 0   ;;  %s694_s10 = smov 0  }
   0x6   :  { %s696_s11 = smov 0   ;;  %s698_s12 = smov 0  }
   0x7   :  { %s700_s13 = smov 0   ;;  %s702_s14 = smov 0  }
   0x8 LB: > { %s437_s15 = sadd.s32 4294967295, %s674_s14   ;;  %s438_s16 = sadd.s32 4294967294, %s674_s14   ;;  %s674_s14 = sphi %s702_s14, %s21_s14   ;;  %s670_s13 = sphi %s700_s13, %s842_s13   ;;  %s666_s12 = sphi %s698_s12, %s841_s12   ;;  %s662_s11 = sphi %s696_s11, %s840_s11   ;;  %s658_s10 = sphi %s694_s10, %s839_s10   ;;  %s654_s9 = sphi %s692_s9, %s838_s9  }
   0x9   : > { %s33_s17 = sadd.s32 1, %s670_s13  ;;  %s42_s18 = sadd.s32 1, %s662_s11 }
   0xa   : > { %p35_p0 = scmp.ge.s32.totalorder %s33_s17, 2  ;;  %p49_p1 = scmp.ne.s32.totalorder %s662_s11, %s658_s10 }
   0xb   : > { %p50_p2 = scmp.eq.s32.totalorder %s674_s14, 0  ;;  %p55_p3 = scmp.ne.s32.totalorder %s658_s10, %s654_s9 }
   0xc   : > { %s844_s17 = smov (%p35_p0, %s33_s17), 0  ;;  %p56_p5 = scmp.eq.s32.totalorder %s437_s15, 0 }
   0xd   : > { %p733_p4 = por %p50_p2, %p49_p1  ;;  %s37_s20 = ssub.s32 %s670_s13, %s844_s17 }
   0xe   : > { %p107_p6 = scmp.eq.s32.totalorder %s437_s15, 1  ;;  %p40_p7 = scmp.eq.s32.totalorder %s37_s20, 0 }
   0xf   : > { %p739_p8 = por %p56_p5, %p55_p3  ;;  %p113_p10 = scmp.eq.s32.totalorder %s438_s16, 1 }
  0x10   : > { %p743_p9 = por %p107_p6, %p49_p1  ;;  %p440_p12 = scmp.ge.s32.totalorder %s674_s14, 2 }
  0x11   : > { %s748_s23 = scalar_select %p40_p7, %s662_s11, %s42_s18  }
  0x12   : > { %p750_p11 = por %p113_p10, %p55_p3  ;;  %p473_p13 = scmp.lt.s32.totalorder %s674_s14, 2 }
  0x13   : > { %s133_s25 = sand.u32 1, %s662_s11   ;;  %s452_s27 = sshll.u32 %s670_s13, 2 }
  0x14   : > { %s441_s26 = sshll.u32 %s133_s25, 2  ;;  %s144_s30 = scalar_lea.hbm %s829_s0, %s452_s27 }
  0x15   : > { %s137_s3 = scalar_lea.vmem [#allocation3], %s441_s26  ;;  %s146_s5 = sshll.u32 %s144_s30, 4  ;;  %s147_s5 = int_to_ptr.hbm [resolvable:$true] %s146_s5 }
  0x16   : > { %s148_s4 = sshll.u32 %s137_s3, 4  ;;  %p463_p0 = pnand %p473_p13, %p733_p4  ;;  %s149_s4 = int_to_ptr.vmem [resolvable:$true] %s148_s4 }
  0x17   : > { %p447_p1 = scmp.ge.s32.totalorder %s674_s14, 1  ;;  %p175_p2 = scmp.lt.s32.totalorder %s674_s14, 3 }
  0x18   : > { %s134_s6 = scalar_lea.sflag [#allocation4], %s133_s25  ;;  %s166_s15 = scalar_lea.hbm %s830_s1, %s452_s27 }
  0x19   : > { %465 = dma.hbm_to_vmem [thread:$0]  (!%p463_p0), %s147_s5, 64, %s149_s4, %s134_s6  }
  0x1a   : > { %p176_p3 = pnand %p447_p1, %p175_p2  ;;  %s159_s16 = scalar_lea.vmem [#allocation6], %s441_s26 }
  0x1b   : > { %s170_s18 = sshll.u32 %s159_s16, 4  ;;  %s168_s20 = sshll.u32 %s166_s15, 4  ;;  %s171_s18 = int_to_ptr.vmem [resolvable:$true] %s170_s18  ;;  %s169_s20 = int_to_ptr.hbm [resolvable:$true] %s168_s20 }
  0x1c   : > { %s156_s28 = scalar_lea.sflag [#allocation7], %s133_s25  ;;  %179 = sbr.rel (%p176_p3) target bundleno = 286 (0x11e), region = 28 }
  0x1d   : > { %468 = dma.hbm_to_vmem [thread:$0]  (!%p463_p0), %s169_s20, 64, %s171_s18, %s156_s28  }
  0x1e   : > { %s769_s19 = sand.u32 (!%p176_p3), 1, %s658_s10  }
  0x1f   : > { %s448_s29 = sshll.u32 (!%p176_p3), %s769_s19, 2  ;;  %s182_s30 = scalar_lea.sflag (!%p176_p3), [#allocation4], %s769_s19 }
  0x20   : > { %s185_s3 = scalar_lea.vmem (!%p176_p3), [#allocation3], %s448_s29 }
  0x21   : > { %641 = dma.done.wait (%p739_p8), %s182_s30, 64  }
  0x22   : > { %643 = vsyncadd (%p739_p8), %s182_s30, 4294967232  ;;  %s192_s26 = scalar_lea.sflag [#allocation7], %s769_s19  ;;  %s195_s25 = scalar_lea.vmem [#allocation6], %s448_s29 }
  0x23   : > { %645 = dma.done.wait (%p739_p8), %s192_s26, 64  }
  0x24   : > { %647 = vsyncadd (%p739_p8), %s192_s26, 4294967232  ;;  %v227_v0 = vlaneseq  ;;  %v676_v2 = vmov 0.0   ;;  %v232_v3 = vld [vmem:[%s185_s3] sm:$0xf]  ;;  %v233_v4 = vld [vmem:[%s195_s25] sm:$0xf]  ;;  %s330_s4 = scalar_lea.hbm %s831_s2, %s666_s12 }
  0x25   : > { %v234_v5 = vsub.f32 %v232_v3, %v233_v4  ;;  %vm242_vm1 = vcmask 1041408   ;;  %vm287_vm6 = vcmask 1040384   ;;  %s220_s5 = scalar_lea.vmem [#allocation8], %s769_s19  ;;  %s334_s7 = sshll.u32 %s330_s4, 4  ;;  %s335_s7 = int_to_ptr.hbm [resolvable:$true] %s334_s7 }
  0x26   : > { %vm782_vm0 = vcmp.lt.s32.totalorder %v227_v0, 256  ;;  %s332_s6 = sshll.u32 %s220_s5, 4  ;;  %s322_s16 = scalar_lea.sflag [#allocation5], %s769_s19  ;;  %s333_s6 = int_to_ptr.vmem [resolvable:$true] %s332_s6 }
  0x27   : > { %231 = vst.msk [vmem:[#allocation2] sm:$0x3] %vm782_vm0, %v676_v2  ;;  %v235_v6 = vmul.f32 %v234_v5, %v234_v5  ;;  %s602_s18 = sshra.s32 %s335_s7, 4  ;;  %s608_s12 = scalar_lea.hbm %s831_s2, 2  ;;  %s603_s18 = int_to_ptr.hbm [resolvable:$true] %s602_s18 }
  0x28   : > { %s604_s20 = scalar_lea.hbm %s603_s18, 1  ;;  %p609_p7 = scmp.lt.s32.totalorder %s603_s18, %s831_s2 }
  0x29   : > { %237 = vst [vmem:[#allocation1] ss:$4 sm:$0xff] %v235_v6  ;;  %p605_p4 = scmp.ne.s32.totalorder %s603_s18, %s604_s20  ;;  %p610_p8 = scmp.lt.s32.totalorder %s608_s12, %s604_s20 }
  0x2b   : > { %p606_p5 = pnand %p605_p4, %p743_p9  ;;  %p611_p10 = por %p610_p8, %p609_p7 }
  0x2d   : > { %p607_p6 = pneg %p606_p5 }
  0x2e   : > { %v257_v43 = vld [vmem:[#allocation2] sm:$0x3] }
  0x2f   : > { %p612_p13 = pnand %p611_p10, %p607_p6 }
  0x30   : > { %v238_v7 = vld.sshfl [vmem:[#allocation1] sm:$0xff pattern:$0x73625140]  ;;  %v239_v8 = vld.sshfl [vmem:[#allocation1 + $0x8] sm:$0xff pattern:$0x73625140] }
  0x31   : > { %v243_v9 = vsel %vm242_vm1, %v238_v7, 0.0  ;;  %v250_v10 = vsel %vm242_vm1, %v239_v8, 0.0 }
  0x32   : > { %v244_v11 = vrot.slane %v243_v9, 4  ;;  %v251_v12 = vrot.slane %v250_v10, 4 }
  0x34   : > { %v245_v13 = vadd.f32 %v244_v11, %v243_v9  ;;  %v252_v14 = vadd.f32 %v251_v12, %v250_v10 }
  0x36   : > { %v246_v15 = vrot.slane %v245_v13, 2  ;;  %v253_v16 = vrot.slane %v252_v14, 2 }
  0x38   : > { %v247_v17 = vadd.f32 %v246_v15, %v245_v13  ;;  %v254_v18 = vadd.f32 %v253_v16, %v252_v14 }
  0x3a   : > { %v248_v19 = vrot.slane %v247_v17, 1  ;;  %v255_v20 = vrot.slane %v254_v18, 1 }
  0x3c   : > { %v249_v21 = vadd.f32 %v248_v19, %v247_v17  ;;  %v256_v22 = vadd.f32 %v255_v20, %v254_v18 }
  0x3e   : > { %524 = vrsqrt.f32 %v249_v21  ;;  %vm267_vm2 = vcmp.eq.f32.partialorder %v249_v21, inf  ;;  %v270_v36 = vand.u32 2147483648, %v249_v21  ;;  %vm279_vm3 = vcmp.eq.f32.partialorder %v256_v22, inf }
  0x3f   : > { %526 = vrsqrt.f32 %v256_v22  ;;  %v282_v37 = vand.u32 2147483648, %v256_v22  ;;  %vm269_vm4 = vcmp.eq.f32.partialorder %v249_v21, 0.0  ;;  %vm281_vm5 = vcmp.eq.f32.partialorder %v256_v22, 0.0 }
  0x44   : > { %v525_v23 = vpop.eup %524 }
  0x45   : > { %v527_v24 = vpop.eup %526  ;;  %v261_v25 = vmul.f32 %v525_v23, %v249_v21 }
  0x46   : > { %v273_v26 = vmul.f32 %v527_v24, %v256_v22 }
  0x47   : > { %v262_v27 = vmul.f32 %v525_v23, %v261_v25 }
  0x48   : > { %v274_v28 = vmul.f32 %v527_v24, %v273_v26 }
  0x49   : > { %v263_v29 = vmul.f32 0.5, %v262_v27 }
  0x4a   : > { %v275_v30 = vmul.f32 0.5, %v274_v28 }
  0x4b   : > { %v264_v31 = vsub.f32 1.5, %v263_v29 }
  0x4c   : > { %v276_v32 = vsub.f32 1.5, %v275_v30 }
  0x4d   : > { %v265_v33 = vmul.f32 %v525_v23, %v264_v31 }
  0x4e   : > { %v277_v34 = vmul.f32 %v527_v24, %v276_v32 }
  0x4f   : > { %v266_v35 = vmul.f32 %v265_v33, %v249_v21 }
  0x50   : > { %v278_v38 = vmul.f32 %v277_v34, %v256_v22 }
  0x51   : > { %v268_v39 = vsel %vm267_vm2, %v249_v21, %v266_v35 }
  0x52   : > { %v280_v40 = vsel %vm279_vm3, %v256_v22, %v278_v38  ;;  %v271_v41 = vsel %vm269_vm4, %v270_v36, %v268_v39 }
  0x53   : > { %v283_v42 = vsel %vm281_vm5, %v282_v37, %v280_v40 }
  0x54   : > { %v286_v44 = vrot.slane %v283_v42, 7 }
  0x56   : > { %v288_v45 = vsel %vm287_vm6, %v271_v41, %v286_v44 }
  0x57   : > { %v290_v46 = vadd.f32 %v288_v45, %v257_v43 }
  0x59   : > { %295 = vst.msk [vmem:[#allocation2] sm:$0x3] %vm782_vm0, %v290_v46 }
  0x60   : > { %v299_v47 = vld [vmem:[#allocation2] sm:$0x3] }
  0x61   : > { %v301_v48 = vperm.slane %v299_v47, 0  ;;  %v302_v49 = vperm.slane %v299_v47, 1 }
  0x63   : > { %v305_v50 = vsel %vm287_vm6, %v301_v48, 0.0  ;;  %v306_v51 = vsel %vm287_vm6, %v302_v49, 0.0 }
  0x64   : > { %v307_v52 = vadd.f32 %v306_v51, %v305_v50 }
  0x66   : > { %308 = vadd.xlane.f32.xlu0 %v307_v52 }
  0xd9   : > { %v309_v53 = vpop.xlane.xlu0 %308 }
  0xda   : > { %v310_v54 = vrot.slane %v309_v53, 4 }
  0xdc   : > { %v311_v55 = vadd.f32 %v310_v54, %v309_v53 }
  0xde   : > { %v312_v56 = vrot.slane %v311_v55, 2 }
  0xe0   : > { %v313_v57 = vadd.f32 %v312_v56, %v311_v55 }
  0xe2   : > { %v314_v58 = vrot.slane %v313_v57, 1 }
  0xe4   : > { %v315_v59 = vadd.f32 %v314_v58, %v313_v57 }
  0xe6   : > { %454 = vpush %v315_v59 }
 0x117   : > { %s455_s8 = spop %454 }
 0x118   : > { %s317_s15 = smul.f32 0.00390625, %s455_s8 }
 0x11a   : > { %v318_v60 = vstv %s317_s15 }
 0x11b   : > { %320 = vst [vmem:[%s220_s5] sm:$0x1] %v318_v60 }
 0x11c   : > { %615 = shalt.err (!%p612_p13)
}
 0x11d   : > { %460 = dma.vmem_to_hbm [thread:$0]  (%p743_p9), %s333_s6, 16, %s335_s7, %s322_s16  }
 0x11e PF: > { %s346_s19 = sand.u32 1, %s654_s9   ;;  %p470_p0 = pnand %p440_p12, %p750_p11 }
 0x11f   : > { %s347_s26 = scalar_lea.sflag [#allocation5], %s346_s19 }
 0x120   : > { %p471_p1 = pneg %p470_p0 }
 0x122   : > { %649 = dma.done.wait (%p471_p1), %s347_s26, 16  }
 0x123   : > { %651 = vsyncadd (%p471_p1), %s347_s26, 4294967280  ;;  %s21_s14 = sadd.s32 1, %s674_s14   ;;  %s838_s9 = smov %s658_s10 }
 0x124   : > { %p18_p2 = scmp.ge.s32.totalorder %s21_s14, 4   ;;  %s839_s10 = smov %s662_s11 }
 0x125   : > { %s840_s11 = smov %s748_s23  ;;  %s841_s12 = smov %s670_s13 }
 0x126   : > { %s842_s13 = smov %s844_s17  ;;  %20 = sbr.rel (!%p18_p2) target bundleno = 8 (0x8), region = 94 }
 0x12b   :  { %352 = vsyncpa [#allocation4], 1 }
 0x12c   :  { %354 = vsyncpa [#allocation4 + $0x1], 1 }
 0x12d   :  { %355 = vsyncpa [#allocation7], 1 }
 0x12e   :  { %357 = vsyncpa [#allocation7 + $0x1], 1 }
 0x12f   :  { %358 = vsyncpa [#allocation5], 1 }
 0x130   :  { %360 = vsyncpa [#allocation5 + $0x1], 1 }

</bundles_post_ra>
